<compile_context>
chip_gen: v5e
topology: v5e:2x2
jax: 0.10.0
libtpu: 0.0.40
codegen_flags: <defaults>
</compile_context>

<pallas_src>
import functools

import jax
import jax.numpy as jnp
from jax.experimental import pallas as pl
from jax.experimental.pallas import tpu as pltpu

GAMMA = 2.5  # matches FocalLoss.__init__ default
# TODO(synk): gamma hardcoded as 2.5 via q*q*sqrt(q); a runtime gamma would need
# exp(gamma*log(q)) on the (already O(N)) focal term.
# TODO(synk): very large C (block no longer fitting VMEM, earliest on v7x's
# 64 MiB) would need a second "arbitrary" grid axis over C with an online
# logsumexp accumulator; not implemented here.
# TODO(synk): if a v7x bf16 bundle dump shows the XLU saturated, sum(exp) could
# be offloaded to the idle MXU (e @ ones) — not done; f32 paths are HBM-bound.


def _round_up(x, m):
    return (x + m - 1) // m * m


def _sublane_multiple(dtype):
    # packed-sublane multiple: 8 for f32, 16 for bf16, 32 for int8/fp8
    return (4 // jnp.dtype(dtype).itemsize) * 8


def _vmem_capacity_bytes():
    try:
        return int(pltpu.get_tpu_info().vmem_capacity_bytes)
    except Exception:
        return 64 * 1024 * 1024  # conservative: v7x per-TensorCore physical VMEM


def _choose_tile_rows(N, C, dtype):
    """Pick the row-tile TN and a per-generation VMEM budget."""
    itemsize = jnp.dtype(dtype).itemsize
    sm = _sublane_multiple(dtype)

    budget = int(_vmem_capacity_bytes() * 0.75)  # headroom for compiler scratch

    # Per-row VMEM: 2x double-buffered logits block + double-buffered targets
    # + ~4 f32 (TN, C) compiler temporaries (cast, shifted, exp, select).
    per_row = C * (2 * itemsize + 4 * 4) + 2 * 4
    tn_vmem = max(sm, (budget // per_row) // sm * sm)

    # ~2 MiB of raw logits per grid step keeps DMA near the HBM roofline.
    tn_traffic = max(sm, ((2 << 20) // max(1, C * itemsize)) // sm * sm)

    tn = min(tn_vmem, tn_traffic)
    # Keep >= 2 tiles so v7x's two TensorCores both get work on the parallel axis.
    if N > sm:
        tn = min(tn, _round_up((N + 1) // 2, sm))
    tn = min(tn, _round_up(N, sm))
    tn = max(sm, tn)

    # Estimated VMEM need for this tile size (with margin), used as the scoped limit.
    est = (2 * tn * (C * itemsize + 4)          # double-buffered inputs
           + 4 * tn * C * 4                     # f32 temporaries
           + 2 * 8 * 128 * 4                    # output blocks
           + (2 << 20))                         # slack
    vmem_limit = min(budget, max(est, 32 << 20))
    return tn, vmem_limit


def focal_loss_kernel(logits_ref, target_ref, out_ref, *, n_rows):
    # logits_ref: (TN, C) input dtype in VMEM (last block may extend past N)
    # target_ref: (TN, 1) int32 in VMEM
    # out_ref:    (1, 8, 128) f32; partial sum at [0,0,0], zeros elsewhere
    i = pl.program_id(0)
    x = logits_ref[...].astype(jnp.float32)            # (TN, C)
    t = target_ref[...]                                # (TN, 1) int32
    tn, c = x.shape

    # --- numerically stable log-sum-exp along the class (lane) dim ---
    m = jnp.max(x, axis=-1, keepdims=True)             # (TN, 1)
    shifted = x - m                                     # (TN, C)
    e = jnp.exp(shifted)                                # only N*C transcendental
    s = jnp.sum(e, axis=-1, keepdims=True)              # (TN, 1)
    lse = jnp.log(s)                                     # O(TN) log

    # --- gather the target column via select (no one-hot materialization) ---
    col = jax.lax.broadcasted_iota(jnp.int32, (tn, c), 1)
    picked_shifted = jnp.sum(jnp.where(col == t, shifted, 0.0),
                             axis=-1, keepdims=True)    # (TN, 1)

    # --- per-row focal term: (1 - p_t)^2.5 * log p_t, all O(TN) ---
    log_p_t = picked_shifted - lse                       # (TN, 1)
    p_t = jnp.exp(log_p_t)                               # (TN, 1)
    q = jnp.maximum(1.0 - p_t, 0.0)                      # clamp rounding negatives
    focal_t = (q * q) * jnp.sqrt(q) * log_p_t            # q^2.5 * log p_t

    # --- mask rows past the true N (partial last block carries garbage);
    #     jnp.where (select) also kills any NaN/inf from those rows ---
    row = jax.lax.broadcasted_iota(jnp.int32, (tn, 1), 0) + i * tn
    tile_sum = jnp.sum(jnp.where(row < n_rows, focal_t, 0.0))

    # Lane-dense (8,128) output block: partial at [0,0,0], zeros elsewhere.
    r8 = jax.lax.broadcasted_iota(jnp.int32, (1, 8, 128), 1)
    c128 = jax.lax.broadcasted_iota(jnp.int32, (1, 8, 128), 2)
    out_ref[...] = jnp.where((r8 == 0) & (c128 == 0), tile_sum, 0.0)


def focal_loss(logits, targets):
    """logits: (N, C); targets: (N,) int class indices. Returns scalar f32 loss."""
    N, C = logits.shape
    itemsize = jnp.dtype(logits.dtype).itemsize

    TN, vmem_limit = _choose_tile_rows(N, C, logits.dtype)
    num_tiles = pl.cdiv(N, TN)

    t = targets.astype(jnp.int32).reshape(N, 1)

    cost = pl.CostEstimate(
        flops=int(6 * N * C),
        transcendentals=int(N * C + 3 * N),
        bytes_accessed=int(N * C * itemsize + 4 * N + num_tiles * 8 * 128 * 4),
    )

    partials = pl.pallas_call(
        functools.partial(focal_loss_kernel, n_rows=N),
        out_shape=jax.ShapeDtypeStruct((num_tiles, 8, 128), jnp.float32),
        grid=(num_tiles,),
        in_specs=[
            pl.BlockSpec((TN, C), lambda i: (i, 0)),
            pl.BlockSpec((TN, 1), lambda i: (i, 0)),
        ],
        out_specs=pl.BlockSpec((1, 8, 128), lambda i: (i, 0, 0)),
        compiler_params=pltpu.CompilerParams(
            dimension_semantics=("parallel",),
            vmem_limit_bytes=int(vmem_limit),
        ),
        cost_estimate=cost,
    )(logits, t)

    # Epilogue: sum per-tile partials once, negate, divide by the TRUE N.
    return -jnp.sum(partials[:, 0, 0]) / jnp.float32(N)


def focal_loss_ref(logits, targets, gamma=GAMMA):
    # pure-JAX reference mirroring the PyTorch forward
    log_prob = jax.nn.log_softmax(logits.astype(jnp.float32), axis=-1)
    prob = jnp.exp(log_prob)
    mod = (1.0 - prob) ** gamma * log_prob
    picked = jnp.take_along_axis(
        mod, targets[:, None].astype(jnp.int32), axis=-1)[:, 0]
    return -jnp.mean(picked)


if __name__ == "__main__":
    key = jax.random.PRNGKey(0)

    cases = [
        ((8, 32), jnp.float32),    # small single-tile case (matches module usage)
        ((37, 96), jnp.float32),   # multi-tile + partial last block (N % TN != 0)
        ((20, 64), jnp.bfloat16),  # bf16 packed-sublane path + partial block
    ]
    for (n, c), dt in cases:
        k1, k2, key = jax.random.split(key, 3)
        logits = jax.random.normal(k1, (n, c), dtype=jnp.float32).astype(dt)
        targets = jax.random.randint(k2, (n,), 0, c, dtype=jnp.int32)

        loss = focal_loss(logits, targets)
        jax.block_until_ready(loss)

        ref = focal_loss_ref(logits, targets)
        assert jnp.allclose(loss, ref, rtol=1e-4, atol=1e-4), (
            (n, c), str(dt), float(loss), float(ref))

    print("KERNEL_OK")
</pallas_src>

<mosaic_0001>
module attributes {stable_mosaic.version = 11 : i64} {
  func.func @focal_loss_kernel(%arg0: i32, %arg1: memref<8x32xf32, #tpu.memory_space<vmem>>, %arg2: memref<8x1xi32, #tpu.memory_space<vmem>>, %arg3: memref<1x8x128xf32, #tpu.memory_space<vmem>>) attributes {dimension_semantics = [#tpu.dimension_semantics<parallel>], iteration_bounds = array<i64: 1>, scalar_prefetch = 0 : i64, scratch_operands = 0 : i64, tpu.core_type = #tpu.core_type<tc>, window_params = [{transform_indices = @transform_0, window_bounds = array<i64: 8, 32>}, {transform_indices = @transform_1, window_bounds = array<i64: 8, 1>}, {transform_indices = @transform_2, window_bounds = array<i64: 1, 8, 128>}]} {
    %c0 = arith.constant 0 : index
    %c0_0 = arith.constant 0 : index
    %0 = vector.load %arg1[%c0, %c0_0] : memref<8x32xf32, #tpu.memory_space<vmem>>, vector<8x32xf32>
    %c0_1 = arith.constant 0 : index
    %c0_2 = arith.constant 0 : index
    %1 = vector.load %arg2[%c0_1, %c0_2] : memref<8x1xi32, #tpu.memory_space<vmem>>, vector<8x1xi32>
    %cst = arith.constant dense<0xFF800000> : vector<8xf32>
    %2 = vector.multi_reduction <maximumf>, %0, %cst [1] : vector<8x32xf32> to vector<8xf32>
    %3 = vector.shape_cast %2 : vector<8xf32> to vector<8x1xf32>
    %4 = vector.broadcast %3 : vector<8x1xf32> to vector<8x32xf32>
    %5 = arith.subf %0, %4 : vector<8x32xf32>
    %6 = math.exp %5 : vector<8x32xf32>
    %cst_3 = arith.constant dense<0.000000e+00> : vector<8xf32>
    %7 = vector.multi_reduction <add>, %6, %cst_3 [1] : vector<8x32xf32> to vector<8xf32>
    %8 = vector.shape_cast %7 : vector<8xf32> to vector<8x1xf32>
    %9 = math.log %8 : vector<8x1xf32>
    %10 = tpu.iota {dimensions = array<i32: 1>} : vector<8x32xi32>
    %11 = vector.broadcast %1 : vector<8x1xi32> to vector<8x32xi32>
    %12 = arith.cmpi eq, %10, %11 : vector<8x32xi32>
    %cst_4 = arith.constant 0.000000e+00 : f32
    %13 = vector.broadcast %cst_4 : f32 to vector<8x32xf32>
    %14 = arith.select %12, %5, %13 : vector<8x32xi1>, vector<8x32xf32>
    %cst_5 = arith.constant dense<0.000000e+00> : vector<8xf32>
    %15 = vector.multi_reduction <add>, %14, %cst_5 [1] : vector<8x32xf32> to vector<8xf32>
    %16 = vector.shape_cast %15 : vector<8xf32> to vector<8x1xf32>
    %17 = arith.subf %16, %9 : vector<8x1xf32>
    %18 = math.exp %17 : vector<8x1xf32>
    %cst_6 = arith.constant 1.000000e+00 : f32
    %19 = vector.broadcast %cst_6 : f32 to vector<8x1xf32>
    %20 = arith.subf %19, %18 : vector<8x1xf32>
    %cst_7 = arith.constant 0.000000e+00 : f32
    %21 = vector.broadcast %cst_7 : f32 to vector<8x1xf32>
    %22 = arith.maximumf %20, %21 : vector<8x1xf32>
    %23 = arith.mulf %22, %22 : vector<8x1xf32>
    %24 = math.sqrt %22 : vector<8x1xf32>
    %25 = arith.mulf %23, %24 : vector<8x1xf32>
    %26 = arith.mulf %25, %17 : vector<8x1xf32>
    %27 = tpu.iota {dimensions = array<i32: 0>} : vector<8x1xi32>
    %c8_i32 = arith.constant 8 : i32
    %28 = arith.muli %arg0, %c8_i32 : i32
    %29 = vector.broadcast %28 : i32 to vector<8x1xi32>
    %30 = arith.addi %27, %29 : vector<8x1xi32>
    %c8_i32_8 = arith.constant 8 : i32
    %31 = vector.broadcast %c8_i32_8 : i32 to vector<8x1xi32>
    %32 = arith.cmpi slt, %30, %31 : vector<8x1xi32>
    %cst_9 = arith.constant 0.000000e+00 : f32
    %33 = vector.broadcast %cst_9 : f32 to vector<8x1xf32>
    %34 = arith.select %32, %26, %33 : vector<8x1xi1>, vector<8x1xf32>
    %35 = vector.shape_cast %34 : vector<8x1xf32> to vector<1x8x1xf32>
    %cst_10 = arith.constant dense<0.000000e+00> : vector<1xf32>
    %36 = vector.multi_reduction <add>, %35, %cst_10 [1, 2] : vector<1x8x1xf32> to vector<1xf32>
    %37 = vector.shape_cast %36 : vector<1xf32> to vector<1x1x1xf32>
    %38 = vector.extract %37[0, 0, 0] : f32 from vector<1x1x1xf32>
    %39 = tpu.iota {dimensions = array<i32: 1>} : vector<1x8x128xi32>
    %40 = tpu.iota {dimensions = array<i32: 2>} : vector<1x8x128xi32>
    %c0_i32 = arith.constant 0 : i32
    %41 = vector.broadcast %c0_i32 : i32 to vector<1x8x128xi32>
    %42 = arith.cmpi eq, %39, %41 : vector<1x8x128xi32>
    %c0_i32_11 = arith.constant 0 : i32
    %43 = vector.broadcast %c0_i32_11 : i32 to vector<1x8x128xi32>
    %44 = arith.cmpi eq, %40, %43 : vector<1x8x128xi32>
    %45 = arith.andi %42, %44 : vector<1x8x128xi1>
    %cst_12 = arith.constant 0.000000e+00 : f32
    %46 = vector.broadcast %38 : f32 to vector<1x8x128xf32>
    %47 = vector.broadcast %cst_12 : f32 to vector<1x8x128xf32>
    %48 = arith.select %45, %46, %47 : vector<1x8x128xi1>, vector<1x8x128xf32>
    %c0_13 = arith.constant 0 : index
    %c0_14 = arith.constant 0 : index
    %c0_15 = arith.constant 0 : index
    %49 = vector.load %arg3[%c0_13, %c0_14, %c0_15] : memref<1x8x128xf32, #tpu.memory_space<vmem>>, vector<1x8x128xf32>
    tpu.vector_store %arg3[%c0_13, %c0_14, %c0_15], %48 {strides = array<i32>} : memref<1x8x128xf32, #tpu.memory_space<vmem>>, vector<1x8x128xf32>,
    return
  }
  func.func @transform_0(%arg0: i32) -> (i32, i32) {
    %c0_i32 = arith.constant 0 : i32
    %c0_i32_0 = arith.constant 0 : i32
    return %arg0, %c0_i32 : i32, i32
  }
  func.func @transform_1(%arg0: i32) -> (i32, i32) {
    %c0_i32 = arith.constant 0 : i32
    %c0_i32_0 = arith.constant 0 : i32
    return %arg0, %c0_i32 : i32, i32
  }
  func.func @transform_2(%arg0: i32) -> (i32, i32, i32) {
    %c0_i32 = arith.constant 0 : i32
    %c0_i32_0 = arith.constant 0 : i32
    %c0_i32_1 = arith.constant 0 : i32
    return %arg0, %c0_i32, %c0_i32_0 : i32, i32, i32
  }
}

</mosaic_0001>

<bundles_post_ra>
// kernel: tpu_custom_call.1
= control target key start
LH: loop header
LB: loop body
LE: loop exit
PB: predicated region body
PF: predicated region fallthrough
CT: control target
= control target key end

     0   :  { %vm14_vm0 = vcmask 261120   ;;  %s164_s0 = inlined_call_operand.vmem [shape: f32[8,32], index: 0, kind: input, shape index: {}]   ;;  %s165_s1 = inlined_call_operand.vmem [shape: s32[8,1], index: 1, kind: input, shape index: {}]   ;;  %s166_s2 = inlined_call_operand.hbm [shape: f32[1,8,128], index: 2, kind: output, shape index: {}]  }
   0x1   :  { %v12_v0 = vld [vmem:[%s164_s0] sm:$0xff] }
   0x2   :  { %7 = vsyncpa [#allocation3], 0  ;;  %v15_v1 = vsel %vm14_vm0, %v12_v0, -inf  ;;  %v135_v2 = vmov 0   ;;  %v13_v3 = vld [vmem:[%s165_s1] sm:$0xff]  ;;  %v26_v9 = vlaneseq  ;;  %vm63_vm4 = vcmask 7168  }
   0x3   :  { %100 = vset.pattern.permute.xlu0 %v135_v2  ;;  %s136_s0 = smov [#allocation2]   ;;  %s87_s15 = sshll.u32 %s166_s2, 4  ;;  %s88_s15 = int_to_ptr.hbm [resolvable:$true] %s87_s15 }
   0x4   :  { %16 = vmax.xlane.f32.xlu0 %v15_v1  ;;  %v27_v10 = vand.u32 127, %v26_v9  ;;  %v57_v44 = vshrl.u32 %v26_v9, 7  ;;  %s85_s1 = sshll.u32 %s136_s0, 4  ;;  %s86_s1 = int_to_ptr.vmem [resolvable:$true] %s85_s1 }
   0x6   :  { %vm74_vm5 = vcmp.eq.s32.totalorder %v57_v44, 0  ;;  %vm75_vm6 = vcmp.eq.s32.totalorder %v27_v10, 0 }
   0x7   :  { %vm76_vm7 = vmand %vm74_vm5, %vm75_vm6 }
  0x18   :  { %29 = vperm.xlu0 %100, %v13_v3  }
  0x77   :  { %v17_v4 = vpop.xlane.xlu0 %16 }
  0x78   :  { %v18_v5 = vsub.f32 %v12_v0, %v17_v4 }
  0x7a   :  { %v19_v6 = vmul.f32 1.442695, %v18_v5 }
  0x7c   :  { %101 = vpow2.f32 %v19_v6 }
  0x82   :  { %v102_v7 = vpop.eup %101 }
  0x83   :  { %v21_v8 = vsel %vm14_vm0, %v102_v7, 0.0 }
  0x84   :  { %22 = vadd.xlane.f32.xlu1 %v21_v8 }
  0x8a   :  { %v30_v11 = vpop.permute.xlu0 %29 }
  0x8b   :  { %vm31_vm1 = vcmp.eq.s32.totalorder %v27_v10, %v30_v11 }
  0x8c   :  { %v32_v12 = vsel %vm31_vm1, %v18_v5, 0.0 }
  0x8d   :  { %v33_v13 = vsel %vm14_vm0, %v32_v12, 0.0 }
  0x8e   :  { %34 = vadd.xlane.f32.xlu1 %v33_v13 }
  0xf7   :  { %v23_v14 = vpop.xlane.xlu1 %22 }
  0xf8   :  { %103 = vlog2.f32 %v23_v14 }
  0xfe   :  { %v104_v15 = vpop.eup %103 }
  0xff   :  { %v25_v16 = vmul.f32 0.6931472, %v104_v15 }
 0x101   :  { %v35_v17 = vpop.xlane.xlu1 %34 }
 0x102   :  { %v36_v18 = vsub.f32 %v35_v17, %v25_v16 }
 0x104   :  { %v37_v19 = vmul.f32 1.442695, %v36_v18 }
 0x106   :  { %105 = vpow2.f32 %v37_v19 }
 0x10c   :  { %v106_v20 = vpop.eup %105 }
 0x10d   :  { %v39_v21 = vsub.f32 1.0, %v106_v20 }
 0x10f   :  { %v40_v22 = vmax.f32 %v39_v21, 0.0 }
 0x111   :  { %107 = vrsqrt.f32 %v40_v22  ;;  %vm49_vm2 = vcmp.eq.f32.partialorder %v40_v22, inf  ;;  %v52_v30 = vand.u32 2147483648, %v40_v22  ;;  %v41_v31 = vmul.f32 %v40_v22, %v40_v22 }
 0x112   :  { %vm51_vm3 = vcmp.eq.f32.partialorder %v40_v22, 0.0 }
 0x117   :  { %v108_v23 = vpop.eup %107 }
 0x118   :  { %v43_v24 = vmul.f32 %v108_v23, %v40_v22 }
 0x11a   :  { %v44_v25 = vmul.f32 %v108_v23, %v43_v24 }
 0x11c   :  { %v45_v26 = vmul.f32 0.5, %v44_v25 }
 0x11e   :  { %v46_v27 = vsub.f32 1.5, %v45_v26 }
 0x120   :  { %v47_v28 = vmul.f32 %v108_v23, %v46_v27 }
 0x122   :  { %v48_v29 = vmul.f32 %v47_v28, %v40_v22 }
 0x124   :  { %v50_v32 = vsel %vm49_vm2, %v40_v22, %v48_v29 }
 0x125   :  { %v53_v33 = vsel %vm51_vm3, %v52_v30, %v50_v32 }
 0x126   :  { %v54_v34 = vmul.f32 %v53_v33, %v41_v31 }
 0x128   :  { %v55_v35 = vmul.f32 %v54_v34, %v36_v18 }
 0x12a   :  { %v64_v36 = vsel %vm63_vm4, %v55_v35, 0.0 }
 0x12b   :  { %65 = vadd.xlane.f32.xlu2 %v64_v36 }
 0x19e   :  { %v66_v37 = vpop.xlane.xlu2 %65 }
 0x19f   :  { %v67_v38 = vrot.slane %v66_v37, 4 }
 0x1a1   :  { %v68_v39 = vadd.f32 %v67_v38, %v66_v37 }
 0x1a3   :  { %v69_v40 = vrot.slane %v68_v39, 2 }
 0x1a5   :  { %v70_v41 = vadd.f32 %v69_v40, %v68_v39 }
 0x1a7   :  { %v71_v42 = vrot.slane %v70_v41, 1 }
 0x1a9   :  { %v72_v43 = vadd.f32 %v71_v42, %v70_v41 }
 0x1ab   :  { %96 = vpush %v72_v43 }
 0x1dc   :  { %s97_s16 = spop %96 }
 0x1dd   :  { %v77_v45 = vstv %s97_s16 }
 0x1de   :  { %v78_v46 = vsel %vm76_vm7, %v77_v45, 0.0 }
 0x1df   :  { %79 = vst [vmem:[#allocation2] sm:$0xff] %v78_v46 }
 0x1e0   :  { %90 = dma.vmem_to_hbm [thread:$0]  %s86_s1, 128, %s88_s15, [#allocation3]  }
 0x1e1   :  { %133 = dma.done.wait [#allocation3], 128  }
 0x1e2   :  { %134 = vsyncadd [#allocation3], 4294967168 }
 0x1e3   :  { %95 = vsyncpa [#allocation3], 1 }

</bundles_post_ra>
